<compile_context>
chip_gen: v6e
topology: v6e:2x2x1
jax: 0.10.0
libtpu: 0.0.40
codegen_flags: <defaults>
</compile_context>

<pallas_src>
import functools

import jax
import jax.numpy as jnp
from jax.experimental import pallas as pl
from jax.experimental.pallas import tpu as pltpu

LANE = 128
MAX_BLOCK_ROWS = 2048   # 2048 x 128 x 4B = 1 MiB per f32 input block
NUM_CORES = 2           # leading "parallel" grid axis (megacore on v7x;
                        # runs sequentially and harmlessly on 1-TC chips)


def _dice_sums_kernel(p_ref, t_ref, out_ref, acc_pt, acc_p, acc_t, *,
                      n_valid, block_rows, blocks_per_core):
    """Per-core partial sums of (sigmoid(p)*t, sigmoid(p), t) over row blocks."""
    c = pl.program_id(0)   # core ("parallel") axis
    i = pl.program_id(1)   # reduction ("arbitrary") axis

    @pl.when(i == 0)
    def _():
        acc_pt[...] = jnp.zeros_like(acc_pt)
        acc_p[...] = jnp.zeros_like(acc_p)
        acc_t[...] = jnp.zeros_like(acc_t)

    # Logical block index for this step. Cores whose range overflows the total
    # block count have their DMA clamped to the last block by the index_map;
    # the mask below uses the *unclamped* logical index, so those steps (and
    # any padded / out-of-bounds tail elements) contribute exactly zero.
    blk = c * blocks_per_core + i
    row0 = blk * block_rows
    row_ids = jax.lax.broadcasted_iota(jnp.int32, (block_rows, LANE), 0)
    col_ids = jax.lax.broadcasted_iota(jnp.int32, (block_rows, LANE), 1)
    valid = (row0 + row_ids) * LANE + col_ids < n_valid

    # Cast in-register (inputs stream in their native dtype); sigmoid -> EUP.
    p = jax.nn.sigmoid(p_ref[...].astype(jnp.float32))
    t = t_ref[...].astype(jnp.float32)
    p = jnp.where(valid, p, 0.0)
    t = jnp.where(valid, t, 0.0)

    # Pure VPU accumulation into full-block VMEM accumulators (no per-step
    # cross-lane reductions; also better summation accuracy than one long
    # serial scalar chain).
    acc_pt[...] += p * t
    acc_p[...] += p
    acc_t[...] += t

    @pl.when(i == pl.num_programs(1) - 1)
    def _():
        # One cross-sublane reduction per core; lane reduction happens in the
        # JAX glue on the tiny (NUM_CORES, 3, 128) output.
        out_ref[0, 0:1, :] = jnp.sum(acc_pt[...], axis=0, keepdims=True)
        out_ref[0, 1:2, :] = jnp.sum(acc_p[...], axis=0, keepdims=True)
        out_ref[0, 2:3, :] = jnp.sum(acc_t[...], axis=0, keepdims=True)


def dice_loss(predictions, targets, smooth=1.0):
    """Pallas implementation of DiceLoss.forward."""
    p = predictions.reshape(-1)
    t = targets.reshape(-1)
    n = p.shape[0]

    # Pad only the sub-lane tail (at most 127 elements) so the flat vector can
    # be viewed as (rows, 128). Pad values are masked out inside the kernel.
    n_lane = ((n + LANE - 1) // LANE) * LANE
    if n_lane != n:
        p = jnp.pad(p, (0, n_lane - n))
        t = jnp.pad(t, (0, n_lane - n))

    rows = n_lane // LANE
    block_rows = min(MAX_BLOCK_ROWS, rows)
    total_blocks = (rows + block_rows - 1) // block_rows
    blocks_per_core = (total_blocks + NUM_CORES - 1) // NUM_CORES

    p2 = p.reshape(rows, LANE)
    t2 = t.reshape(rows, LANE)

    def in_map(c, i):
        # Clamp so overflow steps of the last core never issue an OOB DMA.
        return (jnp.minimum(c * blocks_per_core + i, total_blocks - 1), 0)

    kernel = functools.partial(
        _dice_sums_kernel,
        n_valid=n,
        block_rows=block_rows,
        blocks_per_core=blocks_per_core,
    )

    partials = pl.pallas_call(
        kernel,
        out_shape=jax.ShapeDtypeStruct((NUM_CORES, 3, LANE), jnp.float32),
        grid_spec=pltpu.PrefetchScalarGridSpec(
            num_scalar_prefetch=0,
            grid=(NUM_CORES, blocks_per_core),
            in_specs=[
                pl.BlockSpec((block_rows, LANE), in_map),
                pl.BlockSpec((block_rows, LANE), in_map),
            ],
            out_specs=pl.BlockSpec((1, 3, LANE), lambda c, i: (c, 0, 0)),
            scratch_shapes=[pltpu.VMEM((block_rows, LANE), jnp.float32)] * 3,
        ),
        compiler_params=pltpu.CompilerParams(
            dimension_semantics=("parallel", "arbitrary"),
            vmem_limit_bytes=32 * 1024 * 1024,
        ),
    )(p2, t2)

    sums = jnp.sum(partials, axis=(0, 2))   # -> (3,)
    intersection, p_sum, t_sum = sums[0], sums[1], sums[2]
    dice_score = (2.0 * intersection + smooth) / (p_sum + t_sum + smooth)
    return 1.0 - dice_score


def _dice_loss_ref(predictions, targets, smooth=1.0):
    p = jax.nn.sigmoid(predictions.astype(jnp.float32)).reshape(-1)
    t = targets.astype(jnp.float32).reshape(-1)
    inter = jnp.sum(p * t)
    return 1.0 - (2.0 * inter + smooth) / (jnp.sum(p) + jnp.sum(t) + smooth)


if __name__ == "__main__":
    key = jax.random.PRNGKey(0)
    k1, k2 = jax.random.split(key)

    # Small NCHW segmentation-style inputs: logits + binary ground truth.
    preds = jax.random.normal(k1, (2, 4, 16, 16), dtype=jnp.float32)
    targs = (jax.random.uniform(k2, (2, 4, 16, 16)) > 0.5).astype(jnp.float32)

    loss = dice_loss(preds, targs, smooth=1.0)
    loss = jax.block_until_ready(loss)

    ref = _dice_loss_ref(preds, targs, smooth=1.0)
    assert jnp.allclose(loss, ref, rtol=1e-5, atol=1e-5), (loss, ref)

    print("KERNEL_OK")
</pallas_src>

<mosaic_0001>
module attributes {stable_mosaic.version = 11 : i64} {
  func.func @_dice_sums_kernel(%arg0: i32, %arg1: i32, %arg2: memref<16x128xf32, #tpu.memory_space<vmem>>, %arg3: memref<16x128xf32, #tpu.memory_space<vmem>>, %arg4: memref<1x3x128xf32, #tpu.memory_space<vmem>>, %arg5: memref<16x128xf32, #tpu.memory_space<vmem>>, %arg6: memref<16x128xf32, #tpu.memory_space<vmem>>, %arg7: memref<16x128xf32, #tpu.memory_space<vmem>>) attributes {dimension_semantics = [#tpu.dimension_semantics<parallel>, #tpu.dimension_semantics<arbitrary>], iteration_bounds = array<i64: 2, 1>, scalar_prefetch = 0 : i64, scratch_operands = 3 : i64, tpu.core_type = #tpu.core_type<tc>, window_params = [{transform_indices = @transform_0, window_bounds = array<i64: 16, 128>}, {transform_indices = @transform_1, window_bounds = array<i64: 16, 128>}, {transform_indices = @transform_2, window_bounds = array<i64: 1, 3, 128>}]} {
    %c0_i32 = arith.constant 0 : i32
    %0 = arith.cmpi eq, %arg1, %c0_i32 : i32
    %1 = arith.extui %0 : i1 to i32
    %c0_i32_0 = arith.constant 0 : i32
    %2 = arith.cmpi ne, %1, %c0_i32_0 : i32
    scf.if %2 {
      %cst_20 = arith.constant 0.000000e+00 : f32
      %39 = vector.broadcast %cst_20 : f32 to vector<16x128xf32>
      %c0_21 = arith.constant 0 : index
      %c0_22 = arith.constant 0 : index
      %40 = vector.load %arg5[%c0_21, %c0_22] : memref<16x128xf32, #tpu.memory_space<vmem>>, vector<16x128xf32>
      tpu.vector_store %arg5[%c0_21, %c0_22], %39 {strides = array<i32>} : memref<16x128xf32, #tpu.memory_space<vmem>>, vector<16x128xf32>,
      %cst_23 = arith.constant 0.000000e+00 : f32
      %41 = vector.broadcast %cst_23 : f32 to vector<16x128xf32>
      %c0_24 = arith.constant 0 : index
      %c0_25 = arith.constant 0 : index
      %42 = vector.load %arg6[%c0_24, %c0_25] : memref<16x128xf32, #tpu.memory_space<vmem>>, vector<16x128xf32>
      tpu.vector_store %arg6[%c0_24, %c0_25], %41 {strides = array<i32>} : memref<16x128xf32, #tpu.memory_space<vmem>>, vector<16x128xf32>,
      %cst_26 = arith.constant 0.000000e+00 : f32
      %43 = vector.broadcast %cst_26 : f32 to vector<16x128xf32>
      %c0_27 = arith.constant 0 : index
      %c0_28 = arith.constant 0 : index
      %44 = vector.load %arg7[%c0_27, %c0_28] : memref<16x128xf32, #tpu.memory_space<vmem>>, vector<16x128xf32>
      tpu.vector_store %arg7[%c0_27, %c0_28], %43 {strides = array<i32>} : memref<16x128xf32, #tpu.memory_space<vmem>>, vector<16x128xf32>,
    } else {
    }
    %c1_i32 = arith.constant 1 : i32
    %3 = arith.muli %arg0, %c1_i32 : i32
    %4 = arith.addi %3, %arg1 : i32
    %c16_i32 = arith.constant 16 : i32
    %5 = arith.muli %4, %c16_i32 : i32
    %6 = tpu.iota {dimensions = array<i32: 0>} : vector<16x128xi32>
    %7 = tpu.iota {dimensions = array<i32: 1>} : vector<16x128xi32>
    %8 = vector.broadcast %5 : i32 to vector<16x128xi32>
    %9 = arith.addi %8, %6 : vector<16x128xi32>
    %c128_i32 = arith.constant 128 : i32
    %10 = vector.broadcast %c128_i32 : i32 to vector<16x128xi32>
    %11 = arith.muli %9, %10 : vector<16x128xi32>
    %12 = arith.addi %11, %7 : vector<16x128xi32>
    %c2048_i32 = arith.constant 2048 : i32
    %13 = vector.broadcast %c2048_i32 : i32 to vector<16x128xi32>
    %14 = arith.cmpi slt, %12, %13 : vector<16x128xi32>
    %c0 = arith.constant 0 : index
    %c0_1 = arith.constant 0 : index
    %15 = vector.load %arg2[%c0, %c0_1] : memref<16x128xf32, #tpu.memory_space<vmem>>, vector<16x128xf32>
    %16 = arith.negf %15 : vector<16x128xf32>
    %17 = math.exp %16 : vector<16x128xf32>
    %cst = arith.constant 1.000000e+00 : f32
    %18 = vector.broadcast %cst : f32 to vector<16x128xf32>
    %19 = arith.addf %18, %17 : vector<16x128xf32>
    %20 = arith.divf %18, %19 : vector<16x128xf32>
    %c0_2 = arith.constant 0 : index
    %c0_3 = arith.constant 0 : index
    %21 = vector.load %arg3[%c0_2, %c0_3] : memref<16x128xf32, #tpu.memory_space<vmem>>, vector<16x128xf32>
    %cst_4 = arith.constant 0.000000e+00 : f32
    %22 = vector.broadcast %cst_4 : f32 to vector<16x128xf32>
    %23 = arith.select %14, %20, %22 : vector<16x128xi1>, vector<16x128xf32>
    %cst_5 = arith.constant 0.000000e+00 : f32
    %24 = vector.broadcast %cst_5 : f32 to vector<16x128xf32>
    %25 = arith.select %14, %21, %24 : vector<16x128xi1>, vector<16x128xf32>
    %c0_6 = arith.constant 0 : index
    %c0_7 = arith.constant 0 : index
    %26 = vector.load %arg5[%c0_6, %c0_7] : memref<16x128xf32, #tpu.memory_space<vmem>>, vector<16x128xf32>
    %27 = arith.mulf %23, %25 : vector<16x128xf32>
    %28 = arith.addf %26, %27 : vector<16x128xf32>
    %c0_8 = arith.constant 0 : index
    %c0_9 = arith.constant 0 : index
    %29 = vector.load %arg5[%c0_8, %c0_9] : memref<16x128xf32, #tpu.memory_space<vmem>>, vector<16x128xf32>
    tpu.vector_store %arg5[%c0_8, %c0_9], %28 {strides = array<i32>} : memref<16x128xf32, #tpu.memory_space<vmem>>, vector<16x128xf32>,
    %c0_10 = arith.constant 0 : index
    %c0_11 = arith.constant 0 : index
    %30 = vector.load %arg6[%c0_10, %c0_11] : memref<16x128xf32, #tpu.memory_space<vmem>>, vector<16x128xf32>
    %31 = arith.addf %30, %23 : vector<16x128xf32>
    %c0_12 = arith.constant 0 : index
    %c0_13 = arith.constant 0 : index
    %32 = vector.load %arg6[%c0_12, %c0_13] : memref<16x128xf32, #tpu.memory_space<vmem>>, vector<16x128xf32>
    tpu.vector_store %arg6[%c0_12, %c0_13], %31 {strides = array<i32>} : memref<16x128xf32, #tpu.memory_space<vmem>>, vector<16x128xf32>,
    %c0_14 = arith.constant 0 : index
    %c0_15 = arith.constant 0 : index
    %33 = vector.load %arg7[%c0_14, %c0_15] : memref<16x128xf32, #tpu.memory_space<vmem>>, vector<16x128xf32>
    %34 = arith.addf %33, %25 : vector<16x128xf32>
    %c0_16 = arith.constant 0 : index
    %c0_17 = arith.constant 0 : index
    %35 = vector.load %arg7[%c0_16, %c0_17] : memref<16x128xf32, #tpu.memory_space<vmem>>, vector<16x128xf32>
    tpu.vector_store %arg7[%c0_16, %c0_17], %34 {strides = array<i32>} : memref<16x128xf32, #tpu.memory_space<vmem>>, vector<16x128xf32>,
    %c0_i32_18 = arith.constant 0 : i32
    %36 = arith.cmpi eq, %arg1, %c0_i32_18 : i32
    %37 = arith.extui %36 : i1 to i32
    %c0_i32_19 = arith.constant 0 : i32
    %38 = arith.cmpi ne, %37, %c0_i32_19 : i32
    scf.if %38 {
      %c0_20 = arith.constant 0 : index
      %c0_21 = arith.constant 0 : index
      %39 = vector.load %arg5[%c0_20, %c0_21] : memref<16x128xf32, #tpu.memory_space<vmem>>, vector<16x128xf32>
      %cst_22 = arith.constant dense<0.000000e+00> : vector<128xf32>
      %40 = vector.multi_reduction <add>, %39, %cst_22 [0] : vector<16x128xf32> to vector<128xf32>
      %41 = vector.shape_cast %40 : vector<128xf32> to vector<1x128xf32>
      %c0_23 = arith.constant 0 : index
      %c0_24 = arith.constant 0 : index
      %c0_25 = arith.constant 0 : index
      %42 = vector.load %arg4[%c0_23, %c0_24, %c0_25] : memref<1x3x128xf32, #tpu.memory_space<vmem>>, vector<1x1x128xf32>
      %43 = vector.shape_cast %42 : vector<1x1x128xf32> to vector<1x128xf32>
      %44 = vector.shape_cast %41 : vector<1x128xf32> to vector<1x1x128xf32>
      tpu.vector_store %arg4[%c0_23, %c0_24, %c0_25], %44 {strides = array<i32>} : memref<1x3x128xf32, #tpu.memory_space<vmem>>, vector<1x1x128xf32>,
      %c0_26 = arith.constant 0 : index
      %c0_27 = arith.constant 0 : index
      %45 = vector.load %arg6[%c0_26, %c0_27] : memref<16x128xf32, #tpu.memory_space<vmem>>, vector<16x128xf32>
      %cst_28 = arith.constant dense<0.000000e+00> : vector<128xf32>
      %46 = vector.multi_reduction <add>, %45, %cst_28 [0] : vector<16x128xf32> to vector<128xf32>
      %47 = vector.shape_cast %46 : vector<128xf32> to vector<1x128xf32>
      %c0_29 = arith.constant 0 : index
      %c1 = arith.constant 1 : index
      %c0_30 = arith.constant 0 : index
      %48 = vector.load %arg4[%c0_29, %c1, %c0_30] : memref<1x3x128xf32, #tpu.memory_space<vmem>>, vector<1x1x128xf32>
      %49 = vector.shape_cast %48 : vector<1x1x128xf32> to vector<1x128xf32>
      %50 = vector.shape_cast %47 : vector<1x128xf32> to vector<1x1x128xf32>
      tpu.vector_store %arg4[%c0_29, %c1, %c0_30], %50 {strides = array<i32>} : memref<1x3x128xf32, #tpu.memory_space<vmem>>, vector<1x1x128xf32>,
      %c0_31 = arith.constant 0 : index
      %c0_32 = arith.constant 0 : index
      %51 = vector.load %arg7[%c0_31, %c0_32] : memref<16x128xf32, #tpu.memory_space<vmem>>, vector<16x128xf32>
      %cst_33 = arith.constant dense<0.000000e+00> : vector<128xf32>
      %52 = vector.multi_reduction <add>, %51, %cst_33 [0] : vector<16x128xf32> to vector<128xf32>
      %53 = vector.shape_cast %52 : vector<128xf32> to vector<1x128xf32>
      %c0_34 = arith.constant 0 : index
      %c2 = arith.constant 2 : index
      %c0_35 = arith.constant 0 : index
      %54 = vector.load %arg4[%c0_34, %c2, %c0_35] : memref<1x3x128xf32, #tpu.memory_space<vmem>>, vector<1x1x128xf32>
      %55 = vector.shape_cast %54 : vector<1x1x128xf32> to vector<1x128xf32>
      %56 = vector.shape_cast %53 : vector<1x128xf32> to vector<1x1x128xf32>
      tpu.vector_store %arg4[%c0_34, %c2, %c0_35], %56 {strides = array<i32>} : memref<1x3x128xf32, #tpu.memory_space<vmem>>, vector<1x1x128xf32>,
    } else {
    }
    return
  }
  func.func @transform_0(%arg0: i32, %arg1: i32) -> (i32, i32) {
    %c1_i32 = arith.constant 1 : i32
    %0 = arith.muli %arg0, %c1_i32 : i32
    %1 = arith.addi %0, %arg1 : i32
    %c0_i32 = arith.constant 0 : i32
    %2 = arith.minsi %1, %c0_i32 : i32
    %c0_i32_0 = arith.constant 0 : i32
    %c0_i32_1 = arith.constant 0 : i32
    return %2, %c0_i32_0 : i32, i32
  }
  func.func @transform_1(%arg0: i32, %arg1: i32) -> (i32, i32) {
    %c1_i32 = arith.constant 1 : i32
    %0 = arith.muli %arg0, %c1_i32 : i32
    %1 = arith.addi %0, %arg1 : i32
    %c0_i32 = arith.constant 0 : i32
    %2 = arith.minsi %1, %c0_i32 : i32
    %c0_i32_0 = arith.constant 0 : i32
    %c0_i32_1 = arith.constant 0 : i32
    return %2, %c0_i32_0 : i32, i32
  }
  func.func @transform_2(%arg0: i32, %arg1: i32) -> (i32, i32, i32) {
    %c0_i32 = arith.constant 0 : i32
    %c0_i32_0 = arith.constant 0 : i32
    %c0_i32_1 = arith.constant 0 : i32
    return %arg0, %c0_i32, %c0_i32_0 : i32, i32, i32
  }
}

</mosaic_0001>

<bundles_post_ra>
// kernel: tpu_custom_call.1
= control target key start
LH: loop header
LB: loop body
LE: loop exit
PB: predicated region body
PF: predicated region fallthrough
CT: control target
= control target key end

     0   :  { %7 = vsyncpa [#allocation6], 0  ;;  %s770_s0 = inlined_call_operand.hbm [shape: f32[16,128], index: 0, kind: input, shape index: {}]   ;;  %s771_s1 = inlined_call_operand.hbm [shape: f32[16,128], index: 1, kind: input, shape index: {}]   ;;  %s772_s2 = inlined_call_operand.vmem [shape: f32[2,3,128], index: 2, kind: output, shape index: {}]  }
   0x1   :  { %9 = vsyncpa [#allocation6 + $0x1], 0 }
   0x2   :  { %10 = vsyncpa [#allocation8], 0 }
   0x3   :  { %12 = vsyncpa [#allocation8 + $0x1], 0  ;;  %s654_s9 = smov 0   ;;  %s656_s10 = smov 0  }
   0x4   :  { %s658_s11 = smov 0   ;;  %s660_s12 = smov 0  }
   0x5   :  { %s662_s13 = smov 0  }
   0x6 LB: > { %s435_s14 = sadd.s32 4294967295, %s633_s13   ;;  %s30_s15 = sadd.s32 1, %s629_s12  ;;  %s633_s13 = sphi %s662_s13, %s18_s13   ;;  %s629_s12 = sphi %s660_s12, %s781_s12   ;;  %s625_s11 = sphi %s658_s11, %s780_s11   ;;  %s621_s10 = sphi %s656_s10, %s760_s10   ;;  %s617_s9 = sphi %s654_s9, %s779_s9  }
   0x7   : > { %p32_p0 = scmp.ge.s32.totalorder %s30_s15, 2  ;;  %p614_p1 = scmp.ne.s32.totalorder %s621_s10, 0 }
   0x8   : > { %p51_p2 = scmp.eq.s32.totalorder %s633_s13, 0  ;;  %p56_p3 = scmp.ne.s32.totalorder %s621_s10, %s617_s9 }
   0x9   : > { %s783_s15 = smov (%p32_p0, %s30_s15), 0  ;;  %p57_p4 = scmp.eq.s32.totalorder %s435_s14, 0 }
   0xa   : > { %p52_p5 = por %p614_p1, %p51_p2  ;;  %p467_p7 = scmp.lt.s32.totalorder %s633_s13, 2 }
   0xb   : > { %p684_p6 = por %p57_p4, %p56_p3  ;;  %s635_s17 = smov [#allocation5]  }
   0xc   : > { %s152_s18 = sshll.u32 %s635_s17, 4  ;;  %p689_p8 = pnand %p467_p7, %p52_p5  ;;  %s153_s18 = int_to_ptr.vmem [resolvable:$true] %s152_s18 }
   0xd   : > { %s774_s16 = scalar_select %p684_p6, 1, 0 }
   0xe   : > { %s526_s22 = scalar_lea.hbm %s770_s0, 256  ;;  %p528_p10 = pneg %p689_p8 }
   0xf   : > { %p527_p9 = scmp.ne.s32.totalorder %s770_s0, %s526_s22  ;;  %p533_p13 = scmp.lt.s32.totalorder %s526_s22, %s526_s22 }
  0x11   : > { %p529_p11 = pnand %p528_p10, %p527_p9 }
  0x13   : > { %p530_p12 = pneg %p529_p11 }
  0x15   : > { %p535_p0 = pnand %p533_p13, %p530_p12 }
  0x17   : > { %538 = shalt.err (!%p535_p0)
}
  0x18   : > { %s539_s25 = scalar_lea.vmem %s153_s18, 256  ;;  %s546_s26 = scalar_lea.vmem %s153_s18, 512 }
  0x19   : > { %p540_p1 = scmp.ne.s32.totalorder %s153_s18, %s539_s25  ;;  %p547_p4 = scmp.lt.s32.totalorder %s153_s18, %s153_s18 }
  0x1a   : > { %p548_p5 = scmp.lt.s32.totalorder %s546_s26, %s539_s25 }
  0x1b   : > { %p542_p2 = pnand %p540_p1, %p528_p10 }
  0x1c   : > { %p549_p7 = por %p548_p5, %p547_p4 }
  0x1d   : > { %p543_p3 = pneg %p542_p2 }
  0x1f   : > { %p550_p6 = pnand %p549_p7, %p543_p3 }
  0x21   : > { %553 = shalt.err (!%p550_p6)
}
  0x22   : > { %s636_s27 = smov 128   ;;  %s637_s28 = smov 8  }
  0x23   : > { %463 = dma.hbm_to_vmem [thread:$0]  (!%p689_p8), %s770_s0, 256, %s153_s18, [#allocation6], %s636_s27, %s636_s27, %s637_s28  }
  0x24   : > { %p445_p9 = scmp.ge.s32.totalorder %s633_s13, 1  ;;  %p184_p11 = scmp.lt.s32.totalorder %s633_s13, 3 }
  0x25   : > { %s638_s4 = smov [#allocation7]   ;;  %s554_s8 = scalar_lea.hbm %s771_s1, 256 }
  0x26   : > { %p714_p12 = pnand %p445_p9, %p184_p11  ;;  %s176_s5 = sshll.u32 %s638_s4, 4  ;;  %s177_s5 = int_to_ptr.vmem [resolvable:$true] %s176_s5 }
  0x27   : > { %p555_p6 = scmp.ne.s32.totalorder %s771_s1, %s554_s8  ;;  %p561_p1 = scmp.lt.s32.totalorder %s554_s8, %s554_s8 }
  0x28   : > { %s776_s3 = scalar_select %p714_p12, 1, 0 }
  0x29   : > { %p557_p13 = pnand %p555_p6, %p528_p10 }
  0x2b   : > { %p558_p0 = pneg %p557_p13 }
  0x2d   : > { %p563_p2 = pnand %p561_p1, %p558_p0 }
  0x2f   : > { %566 = shalt.err (!%p563_p2)
}
  0x30   : > { %s567_s17 = scalar_lea.vmem %s177_s5, 256  ;;  %s574_s18 = scalar_lea.vmem %s177_s5, 512 }
  0x31   : > { %p568_p3 = scmp.ne.s32.totalorder %s177_s5, %s567_s17  ;;  %p575_p7 = scmp.lt.s32.totalorder %s177_s5, %s177_s5 }
  0x32   : > { %p576_p9 = scmp.lt.s32.totalorder %s574_s18, %s567_s17 }
  0x33   : > { %p570_p4 = pnand %p568_p3, %p528_p10 }
  0x34   : > { %p577_p11 = por %p576_p9, %p575_p7 }
  0x35   : > { %p571_p5 = pneg %p570_p4 }
  0x37   : > { %p578_p12 = pnand %p577_p11, %p571_p5 }
  0x39   : > { %581 = shalt.err (!%p578_p12)
}
  0x3a   : > { %466 = dma.hbm_to_vmem [thread:$0]  (!%p689_p8), %s771_s1, 256, %s177_s5, [#allocation8], %s636_s27, %s636_s27, %s637_s28  }
  0x3b   : > { %p777_p6 = scmp.ne.s32.totalorder %s776_s3, 0 }
  0x3c   : > { %s190_s22 = sand.u32 (!%p777_p6), 1, %s621_s10   ;;  %p778_p10 = scmp.ne.s32.totalorder (!%p777_p6), %s774_s16, 0 }
  0x3d   : > { %188 = sbr.rel (%p777_p6) target bundleno = 121 (0x79), region = 28  ;;  %s446_s23 = sshll.u32 (!%p777_p6), %s190_s22, 4 }
  0x3e   : > { %s191_s24 = scalar_lea.sflag (!%p777_p6), [#allocation6], %s190_s22  ;;  %s194_s25 = scalar_lea.vmem (!%p777_p6), [#allocation5], %s446_s23 }
  0x42   : > { %607 = dma.done.wait (%p778_p10), %s191_s24, 256  }
  0x43   : > { %609 = vsyncadd (%p778_p10), %s191_s24, 4294967040  ;;  %s200_s19 = scalar_lea.sflag [#allocation8], %s190_s22  ;;  %s203_s26 = scalar_lea.vmem [#allocation7], %s446_s23 }
  0x44   : > { %611 = dma.done.wait (%p778_p10), %s200_s19, 256  }
  0x45   : > { %613 = vsyncadd (%p778_p10), %s200_s19, 4294967040  ;;  %s449_s27 = sshll.u32 %s625_s11, 4  ;;  %v252_v0 = vlaneseq  ;;  %v266_v8 = vld [vmem:[%s194_s25] sm:$0xff]  ;;  %v267_v9 = vld [vmem:[%s194_s25 + $0x8] sm:$0xff]  ;;  %p236_p8 = scmp.lt.s32.totalorder %s625_s11, 1 }
  0x46   : > { %v257_v1 = vstv %s449_s27  ;;  %v450_v12 = vmul.f32 -1.442695, %v266_v8  ;;  %v451_v13 = vmul.f32 -1.442695, %v267_v9  ;;  %v280_v15 = vld [vmem:[%s203_s26] sm:$0xff]  ;;  %v281_v16 = vld [vmem:[%s203_s26 + $0x8] sm:$0xff] }
  0x47   : > { %v253_v2 = vshrl.u32 %v252_v0, 7  ;;  %v256_v4 = vand.u32 127, %v252_v0  ;;  %s785_s11 = smov (!%p236_p8, %s625_s11), 1 }
  0x48   : > { %518 = vpow2.f32 %v450_v12  ;;  %s448_s16 = sshll.u32 %s785_s11, 2 }
  0x49   : > { %v254_v3 = vadd.s32 8, %v253_v2  ;;  %v258_v5 = vadd.s32 %v257_v1, %v253_v2  ;;  %520 = vpow2.f32 %v451_v13  ;;  %s239_s30 = scalar_lea.vmem %s772_s2, %s448_s16 }
  0x4b   : > { %v259_v6 = vadd.s32 %v257_v1, %v254_v3  ;;  %v260_v7 = vmul.u32 128, %v258_v5 }
  0x4d   : > { %v261_v10 = vmul.u32 128, %v259_v6  ;;  %v262_v11 = vadd.s32 %v260_v7, %v256_v4 }
  0x4f   : > { %v263_v14 = vadd.s32 %v261_v10, %v256_v4  ;;  %vm264_vm0 = vcmp.lt.s32.totalorder %v262_v11, 2048 }
  0x50   : > { %v284_v17 = vsel %vm264_vm0, %v280_v15, 0.0 }
  0x51   : > { %vm265_vm1 = vcmp.lt.s32.totalorder %v263_v14, 2048 }
  0x52   : > { %v285_v18 = vsel %vm265_vm1, %v281_v16, 0.0 }
  0x53   : > { %v331_v19 = vadd.f32 %v285_v18, %v284_v17 }
  0x55   : > { %v332_v20 = vrot.slane %v331_v19, 4  ;;  %v519_v24 = vpop.eup %518 }
  0x56   : > { %v521_v25 = vpop.eup %520  ;;  %v274_v26 = vadd.f32 1.0, %v519_v24 }
  0x57   : > { %v333_v21 = vadd.f32 %v332_v20, %v331_v19  ;;  %v275_v28 = vadd.f32 1.0, %v521_v25 }
  0x58   : > { %522 = vrcp.f32 %v274_v26 }
  0x59   : > { %v334_v22 = vrot.slane %v333_v21, 2  ;;  %524 = vrcp.f32 %v275_v28 }
  0x5b   : > { %v335_v23 = vadd.f32 %v334_v22, %v333_v21 }
  0x5d   : > { %v336_v27 = vrot.slane %v335_v23, 1 }
  0x5f   : > { %v337_v29 = vadd.f32 %v336_v27, %v335_v23 }
  0x61   : > { %338 = vst [vmem:[%s239_s30 + $0x2] sm:$0x1] %v337_v29 }
  0x65   : > { %v523_v30 = vpop.eup %522 }
  0x66   : > { %v525_v31 = vpop.eup %524  ;;  %v282_v32 = vsel %vm264_vm0, %v523_v30, 0.0 }
  0x67   : > { %v283_v33 = vsel %vm265_vm1, %v525_v31, 0.0  ;;  %v288_v34 = vmul.f32 %v284_v17, %v282_v32 }
  0x68   : > { %v289_v35 = vmul.f32 %v285_v18, %v283_v33  ;;  %v321_v36 = vadd.f32 %v283_v33, %v282_v32 }
  0x6a   : > { %v311_v37 = vadd.f32 %v289_v35, %v288_v34  ;;  %v322_v38 = vrot.slane %v321_v36, 4 }
  0x6c   : > { %v312_v39 = vrot.slane %v311_v37, 4  ;;  %v323_v40 = vadd.f32 %v322_v38, %v321_v36 }
  0x6e   : > { %v313_v41 = vadd.f32 %v312_v39, %v311_v37  ;;  %v324_v42 = vrot.slane %v323_v40, 2 }
  0x70   : > { %v314_v43 = vrot.slane %v313_v41, 2  ;;  %v325_v44 = vadd.f32 %v324_v42, %v323_v40 }
  0x72   : > { %v315_v45 = vadd.f32 %v314_v43, %v313_v41  ;;  %v326_v46 = vrot.slane %v325_v44, 1 }
  0x74   : > { %v316_v47 = vrot.slane %v315_v45, 1  ;;  %v327_v48 = vadd.f32 %v326_v46, %v325_v44 }
  0x76   : > { %v317_v49 = vadd.f32 %v316_v47, %v315_v45  ;;  %328 = vst [vmem:[%s239_s30 + $0x1] sm:$0x1] %v327_v48 }
  0x78   : > { %318 = vst [vmem:[%s239_s30] sm:$0x1] %v317_v49 }
  0x79 PF: > { %s18_s13 = sadd.s32 1, %s633_s13   ;;  %s779_s9 = smov %s621_s10 }
  0x7a   : > { %p15_p12 = scmp.ge.s32.totalorder %s18_s13, 4   ;;  %s760_s10 = smov 0  }
  0x7b   : > { %s780_s11 = smov %s629_s12  ;;  %s781_s12 = smov %s783_s15 }
  0x7c   :  { %17 = sbr.rel (!%p15_p12) target bundleno = 6 (0x6), region = 89 }
  0x81   :  { %358 = vsyncpa [#allocation6], 1 }
  0x82   :  { %360 = vsyncpa [#allocation6 + $0x1], 1 }
  0x83   :  { %361 = vsyncpa [#allocation8], 1 }
  0x84   :  { %363 = vsyncpa [#allocation8 + $0x1], 1 }

</bundles_post_ra>
